<compile_context>
chip_gen: v7x
topology: tpu7x:2x2x1
jax: 0.10.0
libtpu: 0.0.40
codegen_flags: <defaults>
</compile_context>

<pallas_src>
import functools

import jax
import jax.numpy as jnp
import numpy as np
from jax.experimental import pallas as pl
from jax.experimental.pallas import tpu as pltpu


def _kmax_kernel(x_ref, o_ref, *, k: int):
    """k-max pooling for one (L, TR) tile (rows on the lane axis).

    Writes the (k, TR) output block directly (position-ordered values/row).
    """
    L, _ = x_ref.shape
    work = x_ref[...]
    if work.dtype not in (jnp.float32, jnp.bfloat16):
        work = work.astype(jnp.float32)
    neg_inf = jnp.asarray(-jnp.inf, dtype=work.dtype)

    # Position along the pooled axis lives on the sublane axis: a single
    # (L, 1) iota column that broadcasts across the lane (row) axis.
    pos = jax.lax.broadcasted_iota(jnp.int32, (L, 1), 0)
    sentinel = jnp.int32(L)

    # ---- iteratively pick the k largest values per row (static k loop) ----
    vals = []   # k lane-dense (1, TR) rows of selected values
    idxs = []   # k lane-dense (1, TR) rows of their original positions
    for _ in range(k):
        m = jnp.max(work, axis=0, keepdims=True)             # (1, TR) value
        cand = jnp.where(work == m, pos, sentinel)           # lowest-index tie-break
        sel = jnp.min(cand, axis=0, keepdims=True)           # (1, TR) index
        vals.append(m)
        idxs.append(sel)
        work = jnp.where(pos == sel, neg_inf, work)          # mask chosen slot

    # ---- restore original positional order ---------------------------------
    # k^2/2 compare-swap network on lane-dense (1, TR) rows (ascending index).
    for i in range(k):
        for j in range(k - 1 - i):
            ia, ib = idxs[j], idxs[j + 1]
            va, vb = vals[j], vals[j + 1]
            swap = ia > ib
            idxs[j] = jnp.where(swap, ib, ia)
            idxs[j + 1] = jnp.where(swap, ia, ib)
            vals[j] = jnp.where(swap, vb, va)
            vals[j + 1] = jnp.where(swap, va, vb)

    o_ref[...] = jnp.concatenate(vals, axis=0).astype(o_ref.dtype)  # (k, TR)


def _vmem_capacity_bytes() -> int:
    try:
        return int(pltpu.get_tpu_info().vmem_capacity_bytes)
    except Exception:
        return 64 * 1024 * 1024          # conservative (v7x-sized) default


def _pick_row_tile(rows: int, L: int, work_itemsize: int, vmem_cap: int) -> int:
    """Row-tile size (rows live on the lane axis inside the kernel).

    Budget is generation-aware (vmem_cap from the chip); big enough to
    amortize per-grid-step overhead, small enough for a double-buffered input
    tile plus ~6 live (L, TR) temporaries.
    """
    tile_budget = min(32 << 20, max(vmem_cap // 4, 4 << 20))
    bytes_per_row = L * (2 * work_itemsize + 6 * 4)
    tr_cap = 1024 if vmem_cap >= (96 << 20) else 512
    tr = min(tr_cap, max(8, tile_budget // max(bytes_per_row, 1)))
    if rows > 128:
        # >= 2 grid steps so the "parallel" axis can shard across TCs (v7x).
        tr = min(tr, max(128, ((rows + 1) // 2 // 128) * 128))
    if rows <= tr:
        return rows                       # single full-extent block (always legal)
    if tr >= 128:
        return (tr // 128) * 128          # lane-dense (unmasked) output stores
    # Huge-L fallback: 8-aligned row tile -> masked stores, but stays in VMEM.
    # TODO(synk): stream L in chunks (running top-k) for extremely long axes.
    return max(8, (tr // 8) * 8)


def kmax_pooling(x: jax.Array, k: int) -> jax.Array:
    """k-max pooling along the last axis of a (B, C, L) array."""
    B, C, L = x.shape
    if k > L:
        raise ValueError(f"k={k} exceeds pooled axis length L={L}")
    rows = B * C

    work_dtype = x.dtype if x.dtype in (jnp.float32, jnp.bfloat16) else jnp.float32
    work_itemsize = 2 if work_dtype == jnp.bfloat16 else 4
    vmem_cap = _vmem_capacity_bytes()

    TR = _pick_row_tile(rows, L, work_itemsize, vmem_cap)
    n_tiles = pl.cdiv(rows, TR)
    rows_p = n_tiles * TR

    x2 = x.reshape(rows, L)
    if rows_p != rows:
        # pad with zeros; padded rows' outputs are discarded below
        x2 = jnp.pad(x2, ((0, rows_p - rows), (0, 0)))
    x_t = x2.T                            # (L, rows_p): rows on the lane axis

    itemsize = x.dtype.itemsize
    cost = pl.CostEstimate(
        flops=6 * k * rows_p * L,
        transcendentals=0,
        bytes_accessed=rows_p * L * itemsize + k * rows_p * itemsize,
    )

    out_t = pl.pallas_call(
        functools.partial(_kmax_kernel, k=k),
        out_shape=jax.ShapeDtypeStruct((k, rows_p), x.dtype),
        grid_spec=pltpu.PrefetchScalarGridSpec(
            num_scalar_prefetch=0,
            grid=(n_tiles,),
            in_specs=[pl.BlockSpec((L, TR), lambda i: (0, i))],
            out_specs=pl.BlockSpec((k, TR), lambda i: (0, i)),
        ),
        compiler_params=pltpu.CompilerParams(
            dimension_semantics=("parallel",),          # megacore sharding on v7x
            vmem_limit_bytes=int(min(vmem_cap // 2, 64 << 20)),
        ),
        cost_estimate=cost,
    )(x_t)

    return out_t[:, :rows].T.reshape(B, C, k)


def kmax_pooling_ref(x: jax.Array, k: int) -> jax.Array:
    """Pure-JAX reference mirroring the PyTorch module (dim = last axis)."""
    _, idx = jax.lax.top_k(x, k)
    idx = jnp.sort(idx, axis=-1)
    return jnp.take_along_axis(x, idx, axis=-1)


if __name__ == "__main__":
    key = jax.random.PRNGKey(0)

    # small shape consistent with the module
    B, C, L, k = 2, 4, 16, 4
    x = jax.random.normal(key, (B, C, L), dtype=jnp.float32)
    out = jax.block_until_ready(kmax_pooling(x, k))
    ref = kmax_pooling_ref(x, k)
    np.testing.assert_allclose(np.asarray(out), np.asarray(ref), rtol=1e-6, atol=1e-6)

    # larger shape: exercises the multi-tile (>=2 grid steps) lane-dense path
    B2, C2, L2, k2 = 8, 96, 128, 5
    x2 = jax.random.normal(jax.random.PRNGKey(1), (B2, C2, L2), dtype=jnp.float32)
    out2 = jax.block_until_ready(kmax_pooling(x2, k2))
    ref2 = kmax_pooling_ref(x2, k2)
    np.testing.assert_allclose(np.asarray(out2), np.asarray(ref2), rtol=1e-6, atol=1e-6)

    # bf16 path: the whole max/compare chain stays in bf16 (exact values)
    x3 = jax.random.normal(jax.random.PRNGKey(2), (2, 4, 32), dtype=jnp.bfloat16)
    out3 = jax.block_until_ready(kmax_pooling(x3, 3))
    ref3 = kmax_pooling_ref(x3, 3)
    np.testing.assert_allclose(np.asarray(out3, dtype=np.float32),
                               np.asarray(ref3, dtype=np.float32), rtol=0, atol=0)

    print("KERNEL_OK")
</pallas_src>

<mosaic_0001>
module attributes {stable_mosaic.version = 11 : i64} {
  func.func @_kmax_kernel(%arg0: i32, %arg1: memref<16x8xf32, #tpu.memory_space<vmem>>, %arg2: memref<4x8xf32, #tpu.memory_space<vmem>>) attributes {dimension_semantics = [#tpu.dimension_semantics<parallel>], iteration_bounds = array<i64: 1>, scalar_prefetch = 0 : i64, scratch_operands = 0 : i64, tpu.core_type = #tpu.core_type<tc>, window_params = [{transform_indices = @transform_0, window_bounds = array<i64: 16, 8>}, {transform_indices = @transform_1, window_bounds = array<i64: 4, 8>}]} {
    %c0 = arith.constant 0 : index
    %c0_0 = arith.constant 0 : index
    %0 = vector.load %arg1[%c0, %c0_0] : memref<16x8xf32, #tpu.memory_space<vmem>>, vector<16x8xf32>
    %1 = tpu.iota {dimensions = array<i32: 0>} : vector<16x1xi32>
    %cst = arith.constant dense<0xFF800000> : vector<8xf32>
    %2 = vector.multi_reduction <maximumf>, %0, %cst [0] : vector<16x8xf32> to vector<8xf32>
    %3 = vector.shape_cast %2 : vector<8xf32> to vector<1x8xf32>
    %4 = vector.broadcast %3 : vector<1x8xf32> to vector<16x8xf32>
    %5 = arith.cmpf oeq, %0, %4 : vector<16x8xf32>
    %c16_i32 = arith.constant 16 : i32
    %6 = vector.shape_cast %1 : vector<16x1xi32> to vector<16x1xi32>
    %7 = vector.broadcast %6 : vector<16x1xi32> to vector<16x8xi32>
    %8 = vector.broadcast %c16_i32 : i32 to vector<16x8xi32>
    %9 = arith.select %5, %7, %8 : vector<16x8xi1>, vector<16x8xi32>
    %cst_1 = arith.constant dense<2147483647> : vector<8xi32>
    %10 = vector.multi_reduction <minsi>, %9, %cst_1 [0] : vector<16x8xi32> to vector<8xi32>
    %11 = vector.shape_cast %10 : vector<8xi32> to vector<1x8xi32>
    %12 = vector.broadcast %1 : vector<16x1xi32> to vector<16x8xi32>
    %13 = vector.broadcast %11 : vector<1x8xi32> to vector<16x8xi32>
    %14 = arith.cmpi eq, %12, %13 : vector<16x8xi32>
    %cst_2 = arith.constant 0xFF800000 : f32
    %15 = vector.broadcast %cst_2 : f32 to vector<16x8xf32>
    %16 = arith.select %14, %15, %0 : vector<16x8xi1>, vector<16x8xf32>
    %cst_3 = arith.constant dense<0xFF800000> : vector<8xf32>
    %17 = vector.multi_reduction <maximumf>, %16, %cst_3 [0] : vector<16x8xf32> to vector<8xf32>
    %18 = vector.shape_cast %17 : vector<8xf32> to vector<1x8xf32>
    %19 = vector.broadcast %18 : vector<1x8xf32> to vector<16x8xf32>
    %20 = arith.cmpf oeq, %16, %19 : vector<16x8xf32>
    %c16_i32_4 = arith.constant 16 : i32
    %21 = vector.shape_cast %1 : vector<16x1xi32> to vector<16x1xi32>
    %22 = vector.broadcast %21 : vector<16x1xi32> to vector<16x8xi32>
    %23 = vector.broadcast %c16_i32_4 : i32 to vector<16x8xi32>
    %24 = arith.select %20, %22, %23 : vector<16x8xi1>, vector<16x8xi32>
    %cst_5 = arith.constant dense<2147483647> : vector<8xi32>
    %25 = vector.multi_reduction <minsi>, %24, %cst_5 [0] : vector<16x8xi32> to vector<8xi32>
    %26 = vector.shape_cast %25 : vector<8xi32> to vector<1x8xi32>
    %27 = vector.broadcast %1 : vector<16x1xi32> to vector<16x8xi32>
    %28 = vector.broadcast %26 : vector<1x8xi32> to vector<16x8xi32>
    %29 = arith.cmpi eq, %27, %28 : vector<16x8xi32>
    %cst_6 = arith.constant 0xFF800000 : f32
    %30 = vector.broadcast %cst_6 : f32 to vector<16x8xf32>
    %31 = arith.select %29, %30, %16 : vector<16x8xi1>, vector<16x8xf32>
    %cst_7 = arith.constant dense<0xFF800000> : vector<8xf32>
    %32 = vector.multi_reduction <maximumf>, %31, %cst_7 [0] : vector<16x8xf32> to vector<8xf32>
    %33 = vector.shape_cast %32 : vector<8xf32> to vector<1x8xf32>
    %34 = vector.broadcast %33 : vector<1x8xf32> to vector<16x8xf32>
    %35 = arith.cmpf oeq, %31, %34 : vector<16x8xf32>
    %c16_i32_8 = arith.constant 16 : i32
    %36 = vector.shape_cast %1 : vector<16x1xi32> to vector<16x1xi32>
    %37 = vector.broadcast %36 : vector<16x1xi32> to vector<16x8xi32>
    %38 = vector.broadcast %c16_i32_8 : i32 to vector<16x8xi32>
    %39 = arith.select %35, %37, %38 : vector<16x8xi1>, vector<16x8xi32>
    %cst_9 = arith.constant dense<2147483647> : vector<8xi32>
    %40 = vector.multi_reduction <minsi>, %39, %cst_9 [0] : vector<16x8xi32> to vector<8xi32>
    %41 = vector.shape_cast %40 : vector<8xi32> to vector<1x8xi32>
    %42 = vector.broadcast %1 : vector<16x1xi32> to vector<16x8xi32>
    %43 = vector.broadcast %41 : vector<1x8xi32> to vector<16x8xi32>
    %44 = arith.cmpi eq, %42, %43 : vector<16x8xi32>
    %cst_10 = arith.constant 0xFF800000 : f32
    %45 = vector.broadcast %cst_10 : f32 to vector<16x8xf32>
    %46 = arith.select %44, %45, %31 : vector<16x8xi1>, vector<16x8xf32>
    %cst_11 = arith.constant dense<0xFF800000> : vector<8xf32>
    %47 = vector.multi_reduction <maximumf>, %46, %cst_11 [0] : vector<16x8xf32> to vector<8xf32>
    %48 = vector.shape_cast %47 : vector<8xf32> to vector<1x8xf32>
    %49 = vector.broadcast %48 : vector<1x8xf32> to vector<16x8xf32>
    %50 = arith.cmpf oeq, %46, %49 : vector<16x8xf32>
    %c16_i32_12 = arith.constant 16 : i32
    %51 = vector.shape_cast %1 : vector<16x1xi32> to vector<16x1xi32>
    %52 = vector.broadcast %51 : vector<16x1xi32> to vector<16x8xi32>
    %53 = vector.broadcast %c16_i32_12 : i32 to vector<16x8xi32>
    %54 = arith.select %50, %52, %53 : vector<16x8xi1>, vector<16x8xi32>
    %cst_13 = arith.constant dense<2147483647> : vector<8xi32>
    %55 = vector.multi_reduction <minsi>, %54, %cst_13 [0] : vector<16x8xi32> to vector<8xi32>
    %56 = vector.shape_cast %55 : vector<8xi32> to vector<1x8xi32>
    %57 = arith.cmpi sgt, %11, %26 : vector<1x8xi32>
    %58 = arith.select %57, %26, %11 : vector<1x8xi1>, vector<1x8xi32>
    %59 = arith.select %57, %11, %26 : vector<1x8xi1>, vector<1x8xi32>
    %60 = arith.select %57, %18, %3 : vector<1x8xi1>, vector<1x8xf32>
    %61 = arith.select %57, %3, %18 : vector<1x8xi1>, vector<1x8xf32>
    %62 = arith.cmpi sgt, %59, %41 : vector<1x8xi32>
    %63 = arith.select %62, %41, %59 : vector<1x8xi1>, vector<1x8xi32>
    %64 = arith.select %62, %59, %41 : vector<1x8xi1>, vector<1x8xi32>
    %65 = arith.select %62, %33, %61 : vector<1x8xi1>, vector<1x8xf32>
    %66 = arith.select %62, %61, %33 : vector<1x8xi1>, vector<1x8xf32>
    %67 = arith.cmpi sgt, %64, %56 : vector<1x8xi32>
    %68 = arith.select %67, %56, %64 : vector<1x8xi1>, vector<1x8xi32>
    %69 = arith.select %67, %48, %66 : vector<1x8xi1>, vector<1x8xf32>
    %70 = arith.select %67, %66, %48 : vector<1x8xi1>, vector<1x8xf32>
    %71 = arith.cmpi sgt, %58, %63 : vector<1x8xi32>
    %72 = arith.select %71, %63, %58 : vector<1x8xi1>, vector<1x8xi32>
    %73 = arith.select %71, %58, %63 : vector<1x8xi1>, vector<1x8xi32>
    %74 = arith.select %71, %65, %60 : vector<1x8xi1>, vector<1x8xf32>
    %75 = arith.select %71, %60, %65 : vector<1x8xi1>, vector<1x8xf32>
    %76 = arith.cmpi sgt, %73, %68 : vector<1x8xi32>
    %77 = arith.select %76, %68, %73 : vector<1x8xi1>, vector<1x8xi32>
    %78 = arith.select %76, %69, %75 : vector<1x8xi1>, vector<1x8xf32>
    %79 = arith.select %76, %75, %69 : vector<1x8xi1>, vector<1x8xf32>
    %80 = arith.cmpi sgt, %72, %77 : vector<1x8xi32>
    %81 = arith.select %80, %78, %74 : vector<1x8xi1>, vector<1x8xf32>
    %82 = arith.select %80, %74, %78 : vector<1x8xi1>, vector<1x8xf32>
    %83 = tpu.concatenate %81, %82, %79, %70 in 0 : vector<1x8xf32>, vector<1x8xf32>, vector<1x8xf32>, vector<1x8xf32> -> vector<4x8xf32>
    %c0_14 = arith.constant 0 : index
    %c0_15 = arith.constant 0 : index
    %84 = vector.load %arg2[%c0_14, %c0_15] : memref<4x8xf32, #tpu.memory_space<vmem>>, vector<4x8xf32>
    tpu.vector_store %arg2[%c0_14, %c0_15], %83 {strides = array<i32>} : memref<4x8xf32, #tpu.memory_space<vmem>>, vector<4x8xf32>,
    return
  }
  func.func @transform_0(%arg0: i32) -> (i32, i32) {
    %c0_i32 = arith.constant 0 : i32
    %c0_i32_0 = arith.constant 0 : i32
    return %c0_i32, %arg0 : i32, i32
  }
  func.func @transform_1(%arg0: i32) -> (i32, i32) {
    %c0_i32 = arith.constant 0 : i32
    %c0_i32_0 = arith.constant 0 : i32
    return %c0_i32, %arg0 : i32, i32
  }
}

</mosaic_0001>

<bundles_post_ra>
// kernel: tpu_custom_call.1
= control target key start
LH: loop header
LB: loop body
LE: loop exit
PB: predicated region body
PF: predicated region fallthrough
CT: control target
= control target key end

     0   :  { %6 = vsyncpa [#allocation3], 0  ;;  %vm14_vm0 = vcmask 64512   ;;  %v11_v6 = vlaneseq  ;;  %s281_s0 = inlined_call_operand.vmem [shape: f32[16,8], index: 0, kind: input, shape index: {}]   ;;  %s282_s1 = inlined_call_operand.hbm [shape: f32[4,8], index: 1, kind: output, shape index: {}]  }
   0x1   :  { %v9_v0 = vld [vmem:[%s281_s0] sm:$0xff]  ;;  %v10_v1 = vld [vmem:[%s281_s0 + $0x8] sm:$0xff]  ;;  %s204_s0 = smov [#allocation2]  }
   0x2   :  { %v15_v2 = vsel %vm14_vm0, %v9_v0, -inf  ;;  %v16_v3 = vsel %vm14_vm0, %v10_v1, -inf  ;;  %v223_v9 = vshrl.u32 %v11_v6, 7  ;;  %s171_s10 = sshll.u32 %s204_s0, 4  ;;  %s172_s10 = int_to_ptr.vmem [resolvable:$true] %s171_s10 }
   0x3   :  { %v17_v4 = vmax.f32 %v15_v2, %v16_v3  ;;  %s180_s11 = scalar_lea.vmem %s172_s10, 64  ;;  %p185_p1 = scmp.lt.s32.totalorder %s172_s10, %s172_s10 }
   0x4   :  { %v226_v12 = vadd.s32 8, %v223_v9  ;;  %p181_p0 = scmp.ne.s32.totalorder %s172_s10, %s180_s11  ;;  %p186_p2 = scmp.lt.s32.totalorder %s180_s11, %s180_s11 }
   0x5   :  { %v18_v5 = vrot.slane %v17_v4, 4 }
   0x6   :  { %p187_p3 = por %p186_p2, %p185_p1 }
   0x7   :  { %v19_v7 = vmax.f32 %v17_v4, %v18_v5 }
   0x8   :  { %p188_p4 = pnand %p187_p3, %p181_p0 }
   0x9   :  { %v20_v8 = vrot.slane %v19_v7, 2 }
   0xb   :  { %v21_v10 = vmax.f32 %v19_v7, %v20_v8 }
   0xd   :  { %v22_v11 = vrot.slane %v21_v10, 1 }
   0xf   :  { %v23_v13 = vmax.f32 %v21_v10, %v22_v11 }
  0x11   :  { %vm24_vm1 = vcmp.eq.f32.partialorder %v9_v0, %v23_v13  ;;  %vm25_vm2 = vcmp.eq.f32.partialorder %v10_v1, %v23_v13 }
  0x12   :  { %v26_v14 = vsel %vm24_vm1, %v223_v9, 16  ;;  %v27_v15 = vsel %vm25_vm2, %v226_v12, 16 }
  0x13   :  { %v28_v16 = vsel %vm14_vm0, %v26_v14, 2147483647  ;;  %v29_v17 = vsel %vm14_vm0, %v27_v15, 2147483647 }
  0x14   :  { %vm30_vm3 = vcmp.lt.s32.totalorder %v28_v16, %v29_v17 }
  0x15   :  { %v31_v18 = vsel %vm30_vm3, %v28_v16, %v29_v17 }
  0x16   :  { %v32_v19 = vrot.slane %v31_v18, 4 }
  0x18   :  { %vm33_vm4 = vcmp.lt.s32.totalorder %v31_v18, %v32_v19 }
  0x19   :  { %v34_v20 = vsel %vm33_vm4, %v31_v18, %v32_v19 }
  0x1a   :  { %v35_v21 = vrot.slane %v34_v20, 2 }
  0x1c   :  { %vm36_vm5 = vcmp.lt.s32.totalorder %v34_v20, %v35_v21 }
  0x1d   :  { %v37_v22 = vsel %vm36_vm5, %v34_v20, %v35_v21 }
  0x1e   :  { %v38_v23 = vrot.slane %v37_v22, 1 }
  0x20   :  { %vm39_vm6 = vcmp.lt.s32.totalorder %v37_v22, %v38_v23 }
  0x21   :  { %v40_v24 = vsel %vm39_vm6, %v37_v22, %v38_v23 }
  0x22   :  { %vm41_vm7 = vcmp.eq.s32.totalorder %v223_v9, %v40_v24  ;;  %vm42_vm8 = vcmp.eq.s32.totalorder %v226_v12, %v40_v24 }
  0x23   :  { %v43_v25 = vsel %vm41_vm7, -inf, %v9_v0  ;;  %v44_v26 = vsel %vm42_vm8, -inf, %v10_v1 }
  0x24   :  { %v45_v27 = vsel %vm14_vm0, %v43_v25, -inf  ;;  %v46_v28 = vsel %vm14_vm0, %v44_v26, -inf }
  0x25   :  { %v47_v29 = vmax.f32 %v45_v27, %v46_v28 }
  0x27   :  { %v48_v30 = vrot.slane %v47_v29, 4 }
  0x29   :  { %v49_v31 = vmax.f32 %v47_v29, %v48_v30 }
  0x2b   :  { %v50_v32 = vrot.slane %v49_v31, 2 }
  0x2d   :  { %v51_v33 = vmax.f32 %v49_v31, %v50_v32 }
  0x2f   :  { %v52_v34 = vrot.slane %v51_v33, 1 }
  0x31   :  { %v53_v35 = vmax.f32 %v51_v33, %v52_v34 }
  0x33   :  { %vm54_vm9 = vcmp.eq.f32.partialorder %v43_v25, %v53_v35  ;;  %vm55_vm10 = vcmp.eq.f32.partialorder %v44_v26, %v53_v35 }
  0x34   :  { %v56_v36 = vsel %vm54_vm9, %v223_v9, 16  ;;  %v57_v37 = vsel %vm55_vm10, %v226_v12, 16 }
  0x35   :  { %v58_v38 = vsel %vm14_vm0, %v56_v36, 2147483647  ;;  %v59_v39 = vsel %vm14_vm0, %v57_v37, 2147483647 }
  0x36   :  { %vm60_vm11 = vcmp.lt.s32.totalorder %v58_v38, %v59_v39 }
  0x37   :  { %v61_v40 = vsel %vm60_vm11, %v58_v38, %v59_v39 }
  0x38   :  { %v62_v41 = vrot.slane %v61_v40, 4 }
  0x3a   :  { %vm63_vm12 = vcmp.lt.s32.totalorder %v61_v40, %v62_v41 }
  0x3b   :  { %v64_v42 = vsel %vm63_vm12, %v61_v40, %v62_v41 }
  0x3c   :  { %v65_v43 = vrot.slane %v64_v42, 2 }
  0x3e   :  { %vm66_vm13 = vcmp.lt.s32.totalorder %v64_v42, %v65_v43 }
  0x3f   :  { %v67_v44 = vsel %vm66_vm13, %v64_v42, %v65_v43 }
  0x40   :  { %v68_v45 = vrot.slane %v67_v44, 1 }
  0x42   :  { %vm69_vm14 = vcmp.lt.s32.totalorder %v67_v44, %v68_v45 }
  0x43   :  { %v70_v46 = vsel %vm69_vm14, %v67_v44, %v68_v45 }
  0x44   :  { %vm71_vm15 = vcmp.eq.s32.totalorder %v223_v9, %v70_v46  ;;  %vm72_vm1 = vcmp.eq.s32.totalorder %v226_v12, %v70_v46  ;;  %vm131_vm2 = vcmp.gt.s32.totalorder %v40_v24, %v70_v46 }
  0x45   :  { %v73_v47 = vsel %vm71_vm15, -inf, %v43_v25  ;;  %v74_v48 = vsel %vm72_vm1, -inf, %v44_v26  ;;  %v132_v49 = vsel %vm131_vm2, %v70_v46, %v40_v24  ;;  %v242_v50 = vsel %vm131_vm2, %v40_v24, %v70_v46 }
  0x46   :  { %v75_v51 = vsel %vm14_vm0, %v73_v47, -inf  ;;  %v76_v52 = vsel %vm14_vm0, %v74_v48, -inf  ;;  %v134_v53 = vsel %vm131_vm2, %v53_v35, %v23_v13  ;;  %v135_v54 = vsel %vm131_vm2, %v23_v13, %v53_v35 }
  0x47   :  { %v77_v55 = vmax.f32 %v75_v51, %v76_v52 }
  0x49   :  { %v78_v56 = vrot.slane %v77_v55, 4 }
  0x4b   :  { %v79_v57 = vmax.f32 %v77_v55, %v78_v56 }
  0x4d   :  { %v80_v58 = vrot.slane %v79_v57, 2 }
  0x4f   :  { %v81_v59 = vmax.f32 %v79_v57, %v80_v58 }
  0x51   :  { %v82_v60 = vrot.slane %v81_v59, 1 }
  0x53   :  { %v83_v61 = vmax.f32 %v81_v59, %v82_v60 }
  0x55   :  { %vm84_vm3 = vcmp.eq.f32.partialorder %v73_v47, %v83_v61  ;;  %vm85_vm4 = vcmp.eq.f32.partialorder %v74_v48, %v83_v61 }
  0x56   :  { %v86_v62 = vsel %vm84_vm3, %v223_v9, 16  ;;  %v87_v63 = vsel %vm85_vm4, %v226_v12, 16 }
  0x57   :  { %v88_v0 = vsel %vm14_vm0, %v86_v62, 2147483647  ;;  %v89_v1 = vsel %vm14_vm0, %v87_v63, 2147483647 }
  0x58   :  { %vm90_vm5 = vcmp.lt.s32.totalorder %v88_v0, %v89_v1 }
  0x59   :  { %v91_v2 = vsel %vm90_vm5, %v88_v0, %v89_v1  ;;  %vm157_vm5 = vcmask 1040384  }
  0x5a   :  { %v92_v3 = vrot.slane %v91_v2, 4 }
  0x5c   :  { %vm93_vm6 = vcmp.lt.s32.totalorder %v91_v2, %v92_v3 }
  0x5d   :  { %v94_v4 = vsel %vm93_vm6, %v91_v2, %v92_v3 }
  0x5e   :  { %v95_v5 = vrot.slane %v94_v4, 2 }
  0x60   :  { %vm96_vm7 = vcmp.lt.s32.totalorder %v94_v4, %v95_v5 }
  0x61   :  { %v97_v6 = vsel %vm96_vm7, %v94_v4, %v95_v5  ;;  %vm159_vm7 = vcmask 1041408  }
  0x62   :  { %v98_v7 = vrot.slane %v97_v6, 1 }
  0x64   :  { %vm99_vm8 = vcmp.lt.s32.totalorder %v97_v6, %v98_v7 }
  0x65   :  { %v100_v8 = vsel %vm99_vm8, %v97_v6, %v98_v7  ;;  %vm161_vm8 = vcmask 1042432  }
  0x66   :  { %vm101_vm9 = vcmp.eq.s32.totalorder %v223_v9, %v100_v8  ;;  %vm102_vm10 = vcmp.eq.s32.totalorder %v226_v12, %v100_v8  ;;  %vm136_vm11 = vcmp.gt.s32.totalorder %v242_v50, %v100_v8 }
  0x67   :  { %v103_v10 = vsel %vm101_vm9, -inf, %v73_v47  ;;  %v104_v11 = vsel %vm102_vm10, -inf, %v74_v48  ;;  %v137_v13 = vsel %vm136_vm11, %v100_v8, %v242_v50  ;;  %v139_v16 = vsel %vm136_vm11, %v83_v61, %v135_v54 }
  0x68   :  { %v105_v14 = vsel %vm14_vm0, %v103_v10, -inf  ;;  %v106_v15 = vsel %vm14_vm0, %v104_v11, -inf  ;;  %v140_v17 = vsel %vm136_vm11, %v135_v54, %v83_v61  ;;  %vm145_vm12 = vcmp.gt.s32.totalorder %v132_v49, %v137_v13 }
  0x69   :  { %v107_v18 = vmax.f32 %v105_v14, %v106_v15  ;;  %v146_v19 = vsel %vm145_vm12, %v137_v13, %v132_v49  ;;  %v147_v20 = vsel %vm145_vm12, %v132_v49, %v137_v13  ;;  %v148_v21 = vsel %vm145_vm12, %v139_v16, %v134_v53 }
  0x6a   :  { %v149_v22 = vsel %vm145_vm12, %v134_v53, %v139_v16  ;;  %v138_v39 = vsel %vm136_vm11, %v242_v50, %v100_v8  ;;  %vm163_vm9 = vcmask 60416  }
  0x6b   :  { %v108_v23 = vrot.slane %v107_v18, 4 }
  0x6d   :  { %v109_v24 = vmax.f32 %v107_v18, %v108_v23 }
  0x6f   :  { %v110_v25 = vrot.slane %v109_v24, 2 }
  0x71   :  { %v111_v26 = vmax.f32 %v109_v24, %v110_v25 }
  0x73   :  { %v112_v27 = vrot.slane %v111_v26, 1 }
  0x75   :  { %v113_v28 = vmax.f32 %v111_v26, %v112_v27 }
  0x77   :  { %vm114_vm13 = vcmp.eq.f32.partialorder %v103_v10, %v113_v28  ;;  %vm115_vm14 = vcmp.eq.f32.partialorder %v104_v11, %v113_v28 }
  0x78   :  { %v116_v29 = vsel %vm114_vm13, %v223_v9, 16  ;;  %v117_v30 = vsel %vm115_vm14, %v226_v12, 16 }
  0x79   :  { %v118_v31 = vsel %vm14_vm0, %v116_v29, 2147483647  ;;  %v119_v32 = vsel %vm14_vm0, %v117_v30, 2147483647 }
  0x7a   :  { %vm120_vm15 = vcmp.lt.s32.totalorder %v118_v31, %v119_v32 }
  0x7b   :  { %v121_v33 = vsel %vm120_vm15, %v118_v31, %v119_v32 }
  0x7c   :  { %v122_v34 = vrot.slane %v121_v33, 4 }
  0x7e   :  { %vm123_vm1 = vcmp.lt.s32.totalorder %v121_v33, %v122_v34 }
  0x7f   :  { %v124_v35 = vsel %vm123_vm1, %v121_v33, %v122_v34 }
  0x80   :  { %v125_v36 = vrot.slane %v124_v35, 2 }
  0x82   :  { %vm126_vm2 = vcmp.lt.s32.totalorder %v124_v35, %v125_v36 }
  0x83   :  { %v127_v37 = vsel %vm126_vm2, %v124_v35, %v125_v36 }
  0x84   :  { %v128_v38 = vrot.slane %v127_v37, 1 }
  0x86   :  { %vm129_vm3 = vcmp.lt.s32.totalorder %v127_v37, %v128_v38 }
  0x87   :  { %v130_v9 = vsel %vm129_vm3, %v127_v37, %v128_v38 }
  0x88   :  { %vm141_vm4 = vcmp.gt.s32.totalorder %v138_v39, %v130_v9 }
  0x89   :  { %v142_v12 = vsel %vm141_vm4, %v130_v9, %v138_v39  ;;  %v143_v40 = vsel %vm141_vm4, %v113_v28, %v140_v17  ;;  %v144_v41 = vsel %vm141_vm4, %v140_v17, %v113_v28 }
  0x8a   :  { %vm150_vm0 = vcmp.gt.s32.totalorder %v147_v20, %v142_v12 }
  0x8b   :  { %v151_v42 = vsel %vm150_vm0, %v142_v12, %v147_v20  ;;  %v152_v43 = vsel %vm150_vm0, %v143_v40, %v149_v22  ;;  %v153_v44 = vsel %vm150_vm0, %v149_v22, %v143_v40 }
  0x8c   :  { %vm154_vm6 = vcmp.gt.s32.totalorder %v146_v19, %v151_v42 }
  0x8d   :  { %v155_v45 = vsel %vm154_vm6, %v152_v43, %v148_v21  ;;  %v156_v46 = vsel %vm154_vm6, %v148_v21, %v152_v43 }
  0x8e   :  { %v158_v47 = vsel %vm157_vm5, %v155_v45, %v156_v46 }
  0x8f   :  { %v160_v48 = vsel %vm159_vm7, %v158_v47, %v153_v44 }
  0x90   :  { %v162_v49 = vsel %vm161_vm8, %v160_v48, %v144_v41 }
  0x91   :  { %164 = vst.msk [vmem:[#allocation2] sm:$0xf] %vm163_vm9, %v162_v49 }
  0x92   :  { %191 = shalt.err (!%p188_p4)
}
  0x93   :  { %s192_s14 = scalar_lea.hbm %s282_s1, 64 }
  0x94   :  { %p193_p5 = scmp.ne.s32.totalorder %s282_s1, %s192_s14  ;;  %p196_p6 = scmp.lt.u32.totalorder %s192_s14, %s282_s1 }
  0x96   :  { %p198_p7 = pnand %p196_p6, %p193_p5 }
  0x98   :  { %201 = shalt.err (!%p198_p7)
}
  0x99   :  { %174 = dma.vmem_to_hbm [thread:$0]  %s172_s10, 64, %s282_s1, [#allocation3]  }
  0x9a   :  { %202 = dma.done.wait [#allocation3], 64  }
  0x9b   :  { %203 = vsyncadd [#allocation3], 4294967232 }
  0x9c   :  { %178 = vsyncpa [#allocation3], 1 }

</bundles_post_ra>
